<compile_context>
chip_gen: v7x
topology: tpu7x:2x2x1
jax: 0.10.0
libtpu: 0.0.40
codegen_flags: <defaults>
</compile_context>

<pallas_src>
import jax
import jax.numpy as jnp
from jax.experimental import pallas as pl
from jax.experimental.pallas import tpu as pltpu


def _linear_split_kernel(x_ref, w_ref, b_ref, o_ref, acc_ref):
    """Computes one (tm, tn) tile of y = x @ W + b; K streamed on grid axis 2."""
    k = pl.program_id(2)

    @pl.when(k == 0)
    def _init():
        acc_ref[...] = jnp.zeros_like(acc_ref)

    # MXU matmul on bf16 tiles, f32 accumulation in VMEM scratch.
    acc_ref[...] += jnp.dot(x_ref[...], w_ref[...],
                            preferred_element_type=jnp.float32)

    @pl.when(k == pl.num_programs(2) - 1)
    def _finalize():
        # Bias epilogue in f32, single cast to the output dtype.
        y = acc_ref[...] + b_ref[...].astype(jnp.float32)
        # easydist `split(ret)`: pipeline-stage boundary marker, identity on
        # values — this store *is* the split output.
        # TODO(synk): the fx-graph split annotation itself has no Pallas
        # equivalent; only its (identity) numerics are implemented.
        o_ref[...] = y.astype(o_ref.dtype)


def pipe_split_wrapper_forward(x, w, b, *, tm=256, tn=256, tk=512,
                               compute_dtype=jnp.bfloat16):
    """Forward of PipeSplitWrapper(nn.Linear): y = split(x @ W + b) == x @ W + b.

    x : (M, K) activations.  Stack pipeline micro-batches so M >= 128/256;
        at tiny M the MXU is mostly idle and the kernel is launch overhead.
    w : (K, N) weight, pre-transposed relative to PyTorch (= W_pt.T).
    b : (1, N) bias.
    """
    M, K = x.shape
    Kw, N = w.shape
    assert K == Kw and b.shape == (1, N)

    # Clamp tiles to the problem; keep them MXU / (8,128)-friendly.
    tm = min(tm, M)
    tn = min(tn, N)
    tk = min(tk, K)
    assert M % tm == 0 and N % tn == 0 and K % tk == 0, (
        "pad M/N/K to tile multiples (tiles must be (8,128)/MXU-aligned)")

    out_dtype = x.dtype
    # Feed the MXU in bf16 (halves HBM weight traffic, much higher MXU
    # throughput on v6e/v7x); accumulation stays f32 via preferred_element_type.
    x_c = x.astype(compute_dtype)
    w_c = w.astype(compute_dtype)
    b_c = b.astype(jnp.float32)

    grid = (M // tm, N // tn, K // tk)

    cost = pl.CostEstimate(
        flops=2 * M * K * N,
        transcendentals=0,
        bytes_accessed=(x_c.size * x_c.dtype.itemsize
                        + w_c.size * w_c.dtype.itemsize
                        + b_c.size * b_c.dtype.itemsize
                        + M * N * jnp.dtype(out_dtype).itemsize),
    )

    return pl.pallas_call(
        _linear_split_kernel,
        out_shape=jax.ShapeDtypeStruct((M, N), out_dtype),
        grid_spec=pltpu.PrefetchScalarGridSpec(
            num_scalar_prefetch=0,
            grid=grid,
            in_specs=[
                # x tile follows (i, k): constant across the N axis.
                pl.BlockSpec((tm, tk), lambda i, j, k: (i, k)),
                # W tile follows (k, j): independent of the batch axis, so W is
                # not re-streamed per batch tile.
                pl.BlockSpec((tk, tn), lambda i, j, k: (k, j)),
                # bias follows j only: DMA'd once per output column tile,
                # not once per K step.
                pl.BlockSpec((1, tn), lambda i, j, k: (0, j)),
            ],
            out_specs=pl.BlockSpec((tm, tn), lambda i, j, k: (i, j)),
            scratch_shapes=[pltpu.VMEM((tm, tn), jnp.float32)],
        ),
        compiler_params=pltpu.CompilerParams(
            # M and N are parallel (megacore sharding on v7x); K is the
            # reduction and stays "arbitrary", placed last in the grid.
            dimension_semantics=("parallel", "parallel", "arbitrary"),
            vmem_limit_bytes=32 * 1024 * 1024,
        ),
        cost_estimate=cost,
    )(x_c, w_c, b_c)


if __name__ == "__main__":
    # Small but tileable shapes: M = 256 rows (several stacked pipeline
    # micro-batches), hidden 512 -> 512 linear.  grid = (2, 2, 2).
    M, K, N = 256, 512, 512
    key = jax.random.PRNGKey(0)
    kx, kw, kb = jax.random.split(key, 3)

    x = jax.random.normal(kx, (M, K), dtype=jnp.float32)
    # PyTorch stores weight as (out, in); we keep it as (in, out) = W_pt.T.
    w = jax.random.normal(kw, (K, N), dtype=jnp.float32) * 0.02
    b = jax.random.normal(kb, (1, N), dtype=jnp.float32) * 0.02

    out = pipe_split_wrapper_forward(x, w, b, tm=128, tn=256, tk=256)
    out = jax.block_until_ready(out)

    # Reference with the same bf16 input rounding + f32 accumulation;
    # split == identity.
    xb = x.astype(jnp.bfloat16).astype(jnp.float32)
    wb = w.astype(jnp.bfloat16).astype(jnp.float32)
    ref = xb @ wb + b

    assert out.shape == (M, N) and out.dtype == x.dtype
    assert jnp.allclose(out, ref, atol=2e-3, rtol=2e-3), float(
        jnp.max(jnp.abs(out - ref)))

    print("KERNEL_OK")
</pallas_src>

<mosaic_0001>
module attributes {stable_mosaic.version = 11 : i64} {
  func.func @_linear_split_kernel(%arg0: i32, %arg1: i32, %arg2: i32, %arg3: memref<128x256xbf16, #tpu.memory_space<vmem>>, %arg4: memref<256x256xbf16, #tpu.memory_space<vmem>>, %arg5: memref<1x256xf32, #tpu.memory_space<vmem>>, %arg6: memref<128x256xf32, #tpu.memory_space<vmem>>, %arg7: memref<128x256xf32, #tpu.memory_space<vmem>>) attributes {dimension_semantics = [#tpu.dimension_semantics<parallel>, #tpu.dimension_semantics<parallel>, #tpu.dimension_semantics<arbitrary>], iteration_bounds = array<i64: 2, 2, 2>, scalar_prefetch = 0 : i64, scratch_operands = 1 : i64, tpu.core_type = #tpu.core_type<tc>, window_params = [{transform_indices = @transform_0, window_bounds = array<i64: 128, 256>}, {transform_indices = @transform_1, window_bounds = array<i64: 256, 256>}, {transform_indices = @transform_2, window_bounds = array<i64: 1, 256>}, {transform_indices = @transform_3, window_bounds = array<i64: 128, 256>}]} {
    %c0_i32 = arith.constant 0 : i32
    %0 = arith.cmpi eq, %arg2, %c0_i32 : i32
    %1 = arith.extui %0 : i1 to i32
    %c0_i32_0 = arith.constant 0 : i32
    %2 = arith.cmpi ne, %1, %c0_i32_0 : i32
    scf.if %2 {
      %cst_9 = arith.constant 0.000000e+00 : f32
      %12 = vector.broadcast %cst_9 : f32 to vector<128x256xf32>
      %c0_10 = arith.constant 0 : index
      %c0_11 = arith.constant 0 : index
      %13 = vector.load %arg7[%c0_10, %c0_11] : memref<128x256xf32, #tpu.memory_space<vmem>>, vector<128x256xf32>
      tpu.vector_store %arg7[%c0_10, %c0_11], %12 {strides = array<i32>} : memref<128x256xf32, #tpu.memory_space<vmem>>, vector<128x256xf32>,
    } else {
    }
    %c0 = arith.constant 0 : index
    %c0_1 = arith.constant 0 : index
    %3 = vector.load %arg7[%c0, %c0_1] : memref<128x256xf32, #tpu.memory_space<vmem>>, vector<128x256xf32>
    %c0_2 = arith.constant 0 : index
    %c0_3 = arith.constant 0 : index
    %4 = vector.load %arg3[%c0_2, %c0_3] : memref<128x256xbf16, #tpu.memory_space<vmem>>, vector<128x256xbf16>
    %c0_4 = arith.constant 0 : index
    %c0_5 = arith.constant 0 : index
    %5 = vector.load %arg4[%c0_4, %c0_5] : memref<256x256xbf16, #tpu.memory_space<vmem>>, vector<256x256xbf16>
    %cst = arith.constant dense<0.000000e+00> : vector<128x256xf32>
    %6 = tpu.matmul %4, %5, %cst {dimension_numbers = #tpu.dot_dimension_numbers<[1], [0], [0], [1], [0, 0, 1, 1], [], []>} : vector<128x256xbf16>, vector<256x256xbf16>, vector<128x256xf32> -> vector<128x256xf32>
    %7 = arith.addf %3, %6 : vector<128x256xf32>
    %c0_6 = arith.constant 0 : index
    %c0_7 = arith.constant 0 : index
    %8 = vector.load %arg7[%c0_6, %c0_7] : memref<128x256xf32, #tpu.memory_space<vmem>>, vector<128x256xf32>
    tpu.vector_store %arg7[%c0_6, %c0_7], %7 {strides = array<i32>} : memref<128x256xf32, #tpu.memory_space<vmem>>, vector<128x256xf32>,
    %c1_i32 = arith.constant 1 : i32
    %9 = arith.cmpi eq, %arg2, %c1_i32 : i32
    %10 = arith.extui %9 : i1 to i32
    %c0_i32_8 = arith.constant 0 : i32
    %11 = arith.cmpi ne, %10, %c0_i32_8 : i32
    scf.if %11 {
      %c0_9 = arith.constant 0 : index
      %c0_10 = arith.constant 0 : index
      %12 = vector.load %arg7[%c0_9, %c0_10] : memref<128x256xf32, #tpu.memory_space<vmem>>, vector<128x256xf32>
      %c0_11 = arith.constant 0 : index
      %c0_12 = arith.constant 0 : index
      %13 = vector.load %arg5[%c0_11, %c0_12] : memref<1x256xf32, #tpu.memory_space<vmem>>, vector<1x256xf32>
      %14 = vector.broadcast %13 : vector<1x256xf32> to vector<128x256xf32>
      %15 = arith.addf %12, %14 : vector<128x256xf32>
      %c0_13 = arith.constant 0 : index
      %c0_14 = arith.constant 0 : index
      %16 = vector.load %arg6[%c0_13, %c0_14] : memref<128x256xf32, #tpu.memory_space<vmem>>, vector<128x256xf32>
      tpu.vector_store %arg6[%c0_13, %c0_14], %15 {strides = array<i32>} : memref<128x256xf32, #tpu.memory_space<vmem>>, vector<128x256xf32>,
    } else {
    }
    return
  }
  func.func @transform_0(%arg0: i32, %arg1: i32, %arg2: i32) -> (i32, i32) {
    %c0_i32 = arith.constant 0 : i32
    return %arg0, %arg2 : i32, i32
  }
  func.func @transform_1(%arg0: i32, %arg1: i32, %arg2: i32) -> (i32, i32) {
    %c0_i32 = arith.constant 0 : i32
    return %arg2, %arg1 : i32, i32
  }
  func.func @transform_2(%arg0: i32, %arg1: i32, %arg2: i32) -> (i32, i32) {
    %c0_i32 = arith.constant 0 : i32
    %c0_i32_0 = arith.constant 0 : i32
    return %c0_i32, %arg1 : i32, i32
  }
  func.func @transform_3(%arg0: i32, %arg1: i32, %arg2: i32) -> (i32, i32) {
    %c0_i32 = arith.constant 0 : i32
    return %arg0, %arg1 : i32, i32
  }
}

</mosaic_0001>

<bundles_post_ra>
// kernel: tpu_custom_call.1
= control target key start
LH: loop header
LB: loop body
LE: loop exit
PB: predicated region body
PF: predicated region fallthrough
CT: control target
= control target key end

     0   :  { %s2208_s0 = inlined_call_operand.hbm [shape: bf16[256,512], index: 0, kind: input, shape index: {}]   ;;  %s2209_s1 = inlined_call_operand.hbm [shape: bf16[512,512], index: 1, kind: input, shape index: {}]   ;;  %s2210_s2 = inlined_call_operand.vmem [shape: f32[1,512], index: 2, kind: input, shape index: {}]   ;;  %s2211_s3 = inlined_call_operand.hbm [shape: f32[256,512], index: 3, kind: output, shape index: {}]  }
   0x1   :  { %2228 = sst [smem:[#allocation20_spill]] %s2208_s0 }
   0x2   :  { %2229 = sst [smem:[#allocation21_spill]] %s2210_s2 }
   0x3   :  { %2230 = sst [smem:[#allocation22_spill]] %s2211_s3 }
   0x4   :  { %8 = vsyncpa [#allocation4], 0 }
   0x5   :  { %10 = vsyncpa [#allocation4 + $0x1], 0 }
   0x6   :  { %11 = vsyncpa [#allocation7], 0 }
   0x7   :  { %13 = vsyncpa [#allocation7 + $0x1], 0 }
   0x8   :  { %14 = vsyncpa [#allocation5], 0 }
   0x9   :  { %16 = vsyncpa [#allocation5 + $0x1], 0  ;;  %s1673_s12 = smov 0   ;;  %s1675_s13 = smov 0  }
   0xa   :  { %s1677_s14 = smov 0   ;;  %s1679_s15 = smov 0  }
   0xb   :  { %s1681_s16 = smov 0   ;;  %s1683_s17 = smov 0  }
   0xc   :  { %s1685_s18 = smov 0   ;;  %s1687_s19 = smov 0  }
   0xd   :  { %s1689_s20 = smov 0   ;;  %s1691_s21 = smov 0  }
   0xe   :  { %s1693_s22 = smov 0   ;;  %s1695_s23 = smov 0  }
   0xf   :  { %s1697_s24 = smov 0   ;;  %s1699_s25 = smov 0  }
  0x10   :  { %s1701_s26 = smov 0   ;;  %s1703_s27 = smov 0  }
  0x11 LB: > { %2231 = sst [smem:[#allocation12_spill]] %s1617_s21  ;;  %s1078_s28 = sadd.s32 4294967295, %s1641_s27   ;;  %s1641_s27 = sphi %s1703_s27, %s22_s27   ;;  %s1637_s26 = sphi %s1701_s26, %s2278_s26   ;;  %s1633_s25 = sphi %s1699_s25, %s2291_s25   ;;  %s1629_s24 = sphi %s1697_s24, %s2290_s24   ;;  %s1625_s23 = sphi %s1695_s23, %s2275_s23   ;;  %s1621_s22 = sphi %s1693_s22, %s2289_s22   ;;  %s1617_s21 = sphi %s1691_s21, %s2288_s21   ;;  %s1613_s20 = sphi %s1689_s20, %s2287_s20   ;;  %s1609_s19 = sphi %s1687_s19, %s2286_s19   ;;  %s1605_s18 = sphi %s1685_s18, %s2285_s18   ;;  %s1601_s17 = sphi %s1683_s17, %s2284_s17   ;;  %s1597_s16 = sphi %s1681_s16, %s2283_s16   ;;  %s1593_s15 = sphi %s1679_s15, %s2282_s15   ;;  %s1589_s14 = sphi %s1677_s14, %s2281_s14   ;;  %s1585_s13 = sphi %s1675_s13, %s2280_s13   ;;  %s1581_s12 = sphi %s1673_s12, %s2279_s12  }
  0x12   : > { %2232 = sst [smem:[#allocation13_spill]] %s1621_s22  ;;  %s34_s29 = sadd.s32 1, %s1629_s24 }
  0x13   : > { %2233 = sst [smem:[#allocation14_spill]] %s1625_s23  ;;  %p1753_p0 = scmp.ge.s32.totalorder %s34_s29, 2 }
  0x14   : > { %2234 = sst [smem:[#allocation15_spill]] %s1637_s26  ;;  %p57_p1 = scmp.ne.s32.totalorder %s1613_s20, %s1609_s19 }
  0x15   : > { %s2293_s29 = smov (%p1753_p0, %s34_s29), 0  ;;  %p2217_p2 = scmp.eq.s32.totalorder %s1641_s27, 0 }
  0x16   : > { %2236 = sst [smem:[#allocation16_spill]] %s2293_s29  ;;  %p63_p3 = scmp.ne.s32.totalorder %s1609_s19, %s1605_s18 }
  0x17   : > { %s1769_s6 = ssub.s32 %s1629_s24, %s2293_s29  ;;  %p1771_p4 = scmp.eq.s32.totalorder %s1078_s28, 0 }
  0x18   : > { %p1777_p5 = por %p2217_p2, %p57_p1  ;;  %p1781_p6 = scmp.eq.s32.totalorder %s1078_s28, 7 }
  0x19   : > { %s2237_s7 = scalar_select %p1771_p4, 1, 0 }
  0x1a   : > { %s2239_s9 = scalar_select %p1781_p6, 1, 0 }
  0x1b   : > { %p1787_p7 = por %p1771_p4, %p63_p3  ;;  %p2216_p8 = scmp.lt.s32.totalorder %s1641_s27, 8 }
  0x1c   : > { %s169_s11 = sand.u32 1, %s1613_s20   ;;  %s1084_s5 = sshll.u32 %s1629_s24, 1 }
  0x1d   : > { %s2240_s10 = scalar_select %p1787_p7, 1, 0 }
  0x1e   : > { %s1082_s18 = sshll.u32 %s169_s11, 7  ;;  %s1154_s4 = sshll.u32 %s1637_s26, 6 }
  0x1f   : > { %2241 = sst [smem:[#allocation17_spill]] %s2240_s10  ;;  %s173_s29 = scalar_lea.vmem [#allocation3], %s1082_s18 }
  0x20   : > { %s183_s3 = sshll.u32 %s173_s29, 4  ;;  %s180_s23 = sadd.s32 %s1154_s4, %s1084_s5  ;;  %s1795_s3 = int_to_ptr.vmem [resolvable:$true] %s183_s3 }
  0x21   : > { %s1086_s21 = sshll.u32 %s180_s23, 6  ;;  %p1801_p9 = pnand %p2216_p8, %p1777_p5 }
  0x22   : > { %s2243_s0 = sld [smem:[#allocation20_spill]]  ;;  %s1811_s29 = scalar_lea.sflag [#allocation4], %s169_s11 }
  0x23   : > { %p1417_p12 = pneg %p1801_p9 }
  0x28   : > { %s1808_s10 = scalar_lea.hbm %s2243_s0, %s1086_s21  ;;  %s1420_s21 = scalar_lea.hbm %s2243_s0, 8192 }
  0x29   : > { %s1415_s23 = scalar_lea.hbm %s1808_s10, 2048  ;;  %p1421_p3 = scmp.lt.u32.totalorder %s1808_s10, %s2243_s0 }
  0x2a   : > { %p1416_p11 = scmp.ne.s32.totalorder %s1808_s10, %s1415_s23  ;;  %p1422_p5 = scmp.lt.u32.totalorder %s1420_s21, %s1415_s23 }
  0x2b   : > { %p1424_p2 = scmp.lt.u32.totalorder %s1415_s23, %s1808_s10 }
  0x2c   : > { %p1418_p13 = pnand %p1417_p12, %p1416_p11  ;;  %p1423_p8 = por %p1422_p5, %p1421_p3 }
  0x2e   : > { %p1419_p1 = pneg %p1418_p13  ;;  %p1425_p10 = por %p1424_p2, %p1423_p8 }
  0x30   : > { %p1426_p7 = pnand %p1425_p10, %p1419_p1 }
  0x32   : > { %1429 = shalt.err (!%p1426_p7)
}
  0x33   : > { %s1430_s8 = scalar_lea.vmem %s1795_s3, 2048  ;;  %s1643_s11 = smov [#allocation3]  }
  0x34   : > { %p1431_p11 = scmp.ne.s32.totalorder %s1795_s3, %s1430_s8  ;;  %s1435_s18 = sshll.u32 %s1643_s11, 4  ;;  %s1436_s18 = int_to_ptr.vmem [resolvable:$false] %s1435_s18 }
  0x35   : > { %s1437_s2 = scalar_lea.vmem %s1436_s18, 4096  ;;  %p1438_p4 = scmp.lt.s32.totalorder %s1795_s3, %s1436_s18 }
  0x36   : > { %p1433_p13 = pnand %p1431_p11, %p1417_p12  ;;  %p1439_p3 = scmp.lt.s32.totalorder %s1437_s2, %s1430_s8 }
  0x38   : > { %p1434_p6 = pneg %p1433_p13  ;;  %p1440_p5 = por %p1439_p3, %p1438_p4 }
  0x3a   : > { %p1441_p2 = pnand %p1440_p5, %p1434_p6 }
  0x3c   : > { %1444 = shalt.err (!%p1441_p2)
}
  0x3d   : > { %s2220_s23 = smov 256   ;;  %s2221_s22 = smov 128  }
  0x3e   : > { %s2222_s21 = smov 8   ;;  %p223_p4 = scmp.lt.s32.totalorder %s1641_s27, 9 }
  0x3f   : > { %1198 = dma.hbm_to_vmem [thread:$0]  (!%p1801_p9), %s1808_s10, 2048, %s1795_s3, %s1811_s29, %s2220_s23, %s2221_s22, %s2222_s21  }
  0x40   : > { %p2244_p6 = scmp.ge.s32.totalorder %s1641_s27, 1  ;;  %s1079_s5 = sadd.s32 4294967294, %s1641_s27  }
  0x41   : > { %s37_s8 = sadd.s32 1, %s1633_s25  ;;  %s78_s28 = sadd.s32 1, %s1601_s17 }
  0x42   : > { %p1845_p7 = pnand %p2244_p6, %p223_p4  ;;  %s2295_s8 = smov (!%p1753_p0, %s37_s8), %s1633_s25 }
  0x43   : > { %p85_p8 = scmp.ne.s32.totalorder %s1601_s17, %s1597_s16  ;;  %p39_p10 = scmp.ge.s32.totalorder %s2295_s8, 2 }
  0x44   : > { %p91_p9 = scmp.ne.s32.totalorder %s1597_s16, %s1593_s15  ;;  %p2246_p12 = scmp.eq.s32.totalorder %s1641_s27, 0 }
  0x45   : > { %s132_s10 = sadd.s32 1, %s1589_s14  ;;  %s2297_s8 = smov (%p39_p10, %s2295_s8), 0 }
  0x46   : > { %p1861_p1 = por %p85_p8, %p2246_p12  ;;  %2248 = sst [smem:[#allocation18_spill]] %s2297_s8 }
  0x47   : > { %s2249_s29 = sadd.s32 1, %s1637_s26  ;;  %s74_s30 = ssub.s32 %s1633_s25, %s2297_s8 }
  0x48   : > { %s2299_s29 = smov (!%p39_p10, %s2249_s29), %s1637_s26  ;;  %p2250_p0 = scmp.ne.s32.totalorder %s2237_s7, 0 }
  0x49   : > { %p43_p13 = scmp.ge.s32.totalorder %s2299_s29, 2  ;;  %s75_s15 = sor.u32 %s74_s30, %s1769_s6 }
  0x4a   : > { %p1875_p11 = por %p91_p9, %p2250_p0  ;;  %p76_p3 = scmp.eq.s32.totalorder %s75_s15, 0 }
  0x4b   : > { %p142_p5 = scmp.ne.s32.totalorder %s1589_s14, %s1585_s13  ;;  %s2301_s29 = smov (%p43_p13, %s2299_s29), 0 }
  0x4c   : > { %s2251_s11 = scalar_select %p1875_p11, 1, 0 }
  0x4d   : > { %2252 = sst [smem:[#allocation19_spill]] %s2301_s29  ;;  %s45_s7 = ssub.s32 %s1637_s26, %s2301_s29 }
  0x4e   : > { %s1885_s18 = scalar_select %p76_p3, %s1601_s17, %s78_s28  }
  0x4f   : > { %p2253_p2 = scmp.ne.s32.totalorder %s2239_s9, 0  ;;  %s47_s23 = sor.u32 %s1769_s6, %s45_s7 }
  0x50   : > { %s129_s22 = sor.u32 %s74_s30, %s45_s7  ;;  %p48_p6 = scmp.eq.s32.totalorder %s47_s23, 0 }
  0x51   : > { %p1891_p4 = por %p2253_p2, %p142_p5  ;;  %p130_p8 = scmp.eq.s32.totalorder %s129_s22, 0 }
  0x52   : > { %p148_p10 = scmp.ne.s32.totalorder %s1585_s13, %s1581_s12  ;;  %p149_p9 = scmp.eq.s32.totalorder %s1079_s5, 7 }
  0x53   : > { %s2254_s2 = scalar_select %p1891_p4, 1, 0 }
  0x54   : > { %s2255_s15 = sadd.s32 1, %s1613_s20  ;;  %p1906_p12 = por %p149_p9, %p148_p10 }
  0x55   : > { %s1901_s21 = scalar_select %p48_p6, %s1613_s20, %s2255_s15  }
  0x56   : > { %s1904_s0 = scalar_select %p130_p8, %s1589_s14, %s132_s10  }
  0x57   : > { %s2256_s28 = scalar_select %p1906_p12, 1, 0 }
  0x58   : > { %s193_s9 = sand.u32 1, %s1601_s17   ;;  %s1089_s8 = sshll.u32 %s1633_s25, 1 }
  0x59   : > { %s1087_s29 = sshll.u32 %s193_s9, 8  ;;  %s1155_s6 = sshll.u32 %s1629_s24, 7 }
  0x5a   : > { %s197_s30 = scalar_lea.vmem [#allocation6], %s1087_s29  ;;  %s204_s7 = sadd.s32 %s1155_s6, %s1089_s8 }
  0x5b   : > { %s207_s23 = sshll.u32 %s197_s30, 4  ;;  %s1091_s22 = sshll.u32 %s204_s7, 6  ;;  %s1913_s23 = int_to_ptr.vmem [resolvable:$true] %s207_s23 }
  0x5c   : > { %p2257_p0 = scmp.lt.s32.totalorder %s1641_s27, 8  ;;  %s1926_s26 = scalar_lea.hbm %s2209_s1, %s1091_s22 }
  0x5d   : > { %s1928_s8 = scalar_lea.sflag [#allocation7], %s193_s9  ;;  %s1445_s29 = scalar_lea.hbm %s1926_s26, 4096 }
  0x5e   : > { %p1919_p13 = pnand %p2257_p0, %p1861_p1  ;;  %p1446_p3 = scmp.ne.s32.totalorder %s1926_s26, %s1445_s29 }
  0x5f   : > { %s1450_s30 = scalar_lea.hbm %s2209_s1, 16384  ;;  %p1451_p6 = scmp.lt.u32.totalorder %s1926_s26, %s2209_s1 }
  0x60   : > { %p1447_p1 = pneg %p1919_p13  ;;  %p1452_p8 = scmp.lt.u32.totalorder %s1450_s30, %s1445_s29 }
  0x61   : > { %p1454_p9 = scmp.lt.u32.totalorder %s1445_s29, %s1926_s26 }
  0x62   : > { %p1448_p5 = pnand %p1447_p1, %p1446_p3  ;;  %p1453_p10 = por %p1452_p8, %p1451_p6 }
  0x64   : > { %p1449_p2 = pneg %p1448_p5  ;;  %p1455_p0 = por %p1454_p9, %p1453_p10 }
  0x66   : > { %p1456_p12 = pnand %p1455_p0, %p1449_p2 }
  0x68   : > { %1459 = shalt.err (!%p1456_p12)
}
  0x69   : > { %s1460_s9 = scalar_lea.vmem %s1913_s23, 4096  ;;  %s1647_s10 = smov [#allocation6]  }
  0x6a   : > { %p1461_p3 = scmp.ne.s32.totalorder %s1913_s23, %s1460_s9  ;;  %s1465_s15 = sshll.u32 %s1647_s10, 4  ;;  %s1466_s15 = int_to_ptr.vmem [resolvable:$false] %s1465_s15 }
  0x6b   : > { %s1467_s3 = scalar_lea.vmem %s1466_s15, 8192  ;;  %p1468_p11 = scmp.lt.s32.totalorder %s1913_s23, %s1466_s15 }
  0x6c   : > { %p1463_p5 = pnand %p1461_p3, %p1447_p1  ;;  %p1469_p6 = scmp.lt.s32.totalorder %s1467_s3, %s1460_s9 }
  0x6e   : > { %p1464_p4 = pneg %p1463_p5  ;;  %p1470_p8 = por %p1469_p6, %p1468_p11 }
  0x70   : > { %p1471_p10 = pnand %p1470_p8, %p1464_p4 }
  0x72   : > { %1474 = shalt.err (!%p1471_p10)
}
  0x73   : > { %s2259_s29 = smov 8   ;;  %s2260_s6 = smov 128  }
  0x74   : > { %s2261_s30 = smov 256   ;;  %227 = sbr.rel (%p1845_p7) target bundleno = 509 (0x1fd), region = 32 }
  0x75   : > { %1201 = dma.hbm_to_vmem [thread:$0]  (!%p1919_p13), %s1926_s26, 4096, %s1913_s23, %s1928_s8, %s2261_s30, %s2260_s6, %s2259_s29  }
  0x76   : > { %s2262_s7 = sld [smem:[#allocation17_spill]] (!%p1845_p7)  ;;  %s229_s22 = sand.u32 (!%p1845_p7), 1, %s1609_s19  }
  0x77   : > { %s1093_s10 = sshll.u32 (!%p1845_p7), %s229_s22, 7  ;;  %s230_s9 = scalar_lea.sflag (!%p1845_p7), [#allocation4], %s229_s22 }
  0x78   : > { %s1962_s15 = scalar_lea.vmem (!%p1845_p7), [#allocation3], %s1093_s10 }
  0x7c   : > { %p2263_p11 = scmp.ne.s32.totalorder %s2262_s7, 0 }
  0x7e   : > { %1568 = dma.done.wait (%p2263_p11), %s230_s9, 2048  }
  0x7f   : > { %1570 = vsyncadd (%p2263_p11), %s230_s9, 4294965248  ;;  %s238_s5 = sand.u32 1, %s1597_s16   ;;  %p2264_p7 = scmp.ne.s32.totalorder %s2251_s11, 0 }
  0x80   : > { %s1094_s3 = sshll.u32 %s238_s5, 8  ;;  %s239_s26 = scalar_lea.sflag [#allocation7], %s238_s5 }
  0x81   : > { %s1969_s23 = scalar_lea.vmem [#allocation6], %s1094_s3 }
  0x82   : > { %1572 = dma.done.wait (%p2264_p7), %s239_s26, 4096  }
  0x83   : > { %1574 = vsyncadd (%p2264_p7), %s239_s26, 4294963200  ;;  %s2265_s4 = sld [smem:[#allocation13_spill]]  ;;  %s271_s8 = sand.u32 1, %s1585_s13  }
  0x84   : > { %s1095_s6 = sshll.u32 %s271_s8, 8  ;;  %s2266_s10 = sld [smem:[#allocation21_spill]] }
  0x85   : > { %s1989_s11 = scalar_lea.vmem [#allocation8], %s1095_s6  ;;  %s2267_s5 = sld [smem:[#allocation12_spill]] }
  0x89   : > { %s1977_s29 = sshll.u32 %s2265_s4, 1 }
  0x8a   : > { %p279_p4 = scmp.lt.s32.totalorder %s1977_s29, 3 }
  0x8b   : > { %p1097_p12 = scmp.ne.s32.totalorder %s2267_s5, 0 }
  0x8c   : > { %s1983_s30 = scalar_select %p279_p4, %s1977_s29, 3 }
  0x8d   : > { %288 = sbr.rel (%p1097_p12) target bundleno = 158 (0x9e), region = 44  ;;  %v1648_v0 = vmov (!%p1097_p12), 0.0  }
  0x8e   : > { %s281_s9 = scalar_lea.vmem %s2266_s10, %s1983_s30  ;;  %289 = vst [vmem:[#allocation2] sm:$0xff] (!%p1097_p12), %v1648_v0  ;;  %290 = vst [vmem:[#allocation2 + $0x8] sm:$0xff] (!%p1097_p12), %v1648_v0 }
  0x8f   : > { %291 = vst [vmem:[#allocation2 + $0x10] sm:$0xff] (!%p1097_p12), %v1648_v0  ;;  %292 = vst [vmem:[#allocation2 + $0x18] sm:$0xff] (!%p1097_p12), %v1648_v0 }
  0x90   : > { %293 = vst [vmem:[#allocation2 + $0x20] sm:$0xff] (!%p1097_p12), %v1648_v0  ;;  %294 = vst [vmem:[#allocation2 + $0x28] sm:$0xff] (!%p1097_p12), %v1648_v0 }
  0x91   : > { %295 = vst [vmem:[#allocation2 + $0x30] sm:$0xff] (!%p1097_p12), %v1648_v0  ;;  %296 = vst [vmem:[#allocation2 + $0x38] sm:$0xff] (!%p1097_p12), %v1648_v0 }
  0x92   : > { %297 = vst [vmem:[#allocation2 + $0x40] sm:$0xff] (!%p1097_p12), %v1648_v0  ;;  %298 = vst [vmem:[#allocation2 + $0x48] sm:$0xff] (!%p1097_p12), %v1648_v0 }
  0x93   : > { %299 = vst [vmem:[#allocation2 + $0x50] sm:$0xff] (!%p1097_p12), %v1648_v0  ;;  %300 = vst [vmem:[#allocation2 + $0x58] sm:$0xff] (!%p1097_p12), %v1648_v0 }
  0x94   : > { %301 = vst [vmem:[#allocation2 + $0x60] sm:$0xff] %v1648_v0  ;;  %302 = vst [vmem:[#allocation2 + $0x68] sm:$0xff] %v1648_v0 }
  0x95   : > { %303 = vst [vmem:[#allocation2 + $0x70] sm:$0xff] %v1648_v0  ;;  %304 = vst [vmem:[#allocation2 + $0x78] sm:$0xff] %v1648_v0 }
  0x96   : > { %305 = vst [vmem:[#allocation2 + $0x80] sm:$0xff] %v1648_v0  ;;  %306 = vst [vmem:[#allocation2 + $0x88] sm:$0xff] %v1648_v0 }
  0x97   : > { %307 = vst [vmem:[#allocation2 + $0x90] sm:$0xff] %v1648_v0  ;;  %308 = vst [vmem:[#allocation2 + $0x98] sm:$0xff] %v1648_v0 }
  0x98   : > { %309 = vst [vmem:[#allocation2 + $0xa0] sm:$0xff] %v1648_v0  ;;  %310 = vst [vmem:[#allocation2 + $0xa8] sm:$0xff] %v1648_v0 }
  0x99   : > { %311 = vst [vmem:[#allocation2 + $0xb0] sm:$0xff] %v1648_v0  ;;  %312 = vst [vmem:[#allocation2 + $0xb8] sm:$0xff] %v1648_v0 }
  0x9a   : > { %313 = vst [vmem:[#allocation2 + $0xc0] sm:$0xff] %v1648_v0  ;;  %314 = vst [vmem:[#allocation2 + $0xc8] sm:$0xff] %v1648_v0 }
  0x9b   : > { %315 = vst [vmem:[#allocation2 + $0xd0] sm:$0xff] %v1648_v0  ;;  %316 = vst [vmem:[#allocation2 + $0xd8] sm:$0xff] %v1648_v0 }
  0x9c   : > { %317 = vst [vmem:[#allocation2 + $0xe0] sm:$0xff] %v1648_v0  ;;  %318 = vst [vmem:[#allocation2 + $0xe8] sm:$0xff] %v1648_v0 }
  0x9d   : > { %319 = vst [vmem:[#allocation2 + $0xf0] sm:$0xff] %v1648_v0  ;;  %320 = vst [vmem:[#allocation2 + $0xf8] sm:$0xff] %v1648_v0 }
  0x9e PF: > { %v1343_v1 = vld [vmem:[%s1969_s23 + $0x4] ss:$8 sps:$4 sm:$0xff]   ;;  %v1345_v2 = vld [vmem:[%s1969_s23] ss:$8 sps:$4 sm:$0xff]   ;;  %v1346_v3 = vld [vmem:[%s1969_s23 + $0x14] ss:$8 sps:$4 sm:$0xff]  }
  0x9f   : > { %641 = vmatprep.subr.bf16.mxu0 %v1343_v1  ;;  %1157 = vmatprep.subr.bf16.mxu1 %v1343_v1  ;;  %v1348_v4 = vld [vmem:[%s1969_s23 + $0x10] ss:$8 sps:$4 sm:$0xff]   ;;  %v1349_v5 = vld [vmem:[%s1969_s23 + $0x24] ss:$8 sps:$4 sm:$0xff]   ;;  %v1351_v6 = vld [vmem:[%s1969_s23 + $0x20] ss:$8 sps:$4 sm:$0xff]  }
  0xa0   : > { %642 = vmatpush1.bf16.msra.mxu0 %v1345_v2  ;;  %1173 = vmatpush1.bf16.msra.mxu1 %v1345_v2  ;;  %v1352_v7 = vld [vmem:[%s1969_s23 + $0x34] ss:$8 sps:$4 sm:$0xff]   ;;  %v1354_v8 = vld [vmem:[%s1969_s23 + $0x30] ss:$8 sps:$4 sm:$0xff]   ;;  %v1355_v9 = vld [vmem:[%s1969_s23 + $0x44] ss:$8 sps:$4 sm:$0xff]  }
  0xa1   : > { %643 = vmatprep.subr.bf16.mxu0 %v1346_v3  ;;  %1158 = vmatprep.subr.bf16.mxu1 %v1346_v3  ;;  %v1357_v10 = vld [vmem:[%s1969_s23 + $0x40] ss:$8 sps:$4 sm:$0xff]   ;;  %v1358_v11 = vld [vmem:[%s1969_s23 + $0x54] ss:$8 sps:$4 sm:$0xff]   ;;  %v1360_v12 = vld [vmem:[%s1969_s23 + $0x50] ss:$8 sps:$4 sm:$0xff]  }
  0xa2   : > { %v1361_v13 = vld [vmem:[%s1969_s23 + $0x64] ss:$8 sps:$4 sm:$0xff]   ;;  %v1363_v15 = vld [vmem:[%s1969_s23 + $0x60] ss:$8 sps:$4 sm:$0xff]   ;;  %v1364_v17 = vld [vmem:[%s1969_s23 + $0x74] ss:$8 sps:$4 sm:$0xff]  }
  0xa3   : > { %v1393_v14 = vld [vmem:[%s1962_s15 + $0x4] ss:$8 sps:$4 sm:$0xff]   ;;  %v1366_v18 = vld [vmem:[%s1969_s23 + $0x70] ss:$8 sps:$4 sm:$0xff]   ;;  %v1369_v20 = vld [vmem:[%s1969_s23 + $0x80] ss:$8 sps:$4 sm:$0xff]  }
  0xa4   : > { %644 = vmatpush1.bf16.msra.mxu0 %v1348_v4  ;;  %1174 = vmatpush1.bf16.msra.mxu1 %v1348_v4  ;;  %v1396_v16 = vld [vmem:[%s1962_s15 + $0x44] ss:$8 sps:$4 sm:$0xff]   ;;  %v1370_v21 = vld [vmem:[%s1969_s23 + $0x94] ss:$8 sps:$4 sm:$0xff]   ;;  %v1372_v22 = vld [vmem:[%s1969_s23 + $0x90] ss:$8 sps:$4 sm:$0xff]  }
  0xa5   : > { %645 = vmatprep.subr.bf16.mxu0 %v1349_v5  ;;  %1159 = vmatprep.subr.bf16.mxu1 %v1349_v5  ;;  %v1367_v19 = vld [vmem:[%s1969_s23 + $0x84] ss:$8 sps:$4 sm:$0xff]   ;;  %v1375_v24 = vld [vmem:[%s1969_s23 + $0xa0] ss:$8 sps:$4 sm:$0xff]   ;;  %v1376_v25 = vld [vmem:[%s1969_s23 + $0xb4] ss:$8 sps:$4 sm:$0xff]  }
  0xa6   : > { %673 = vmatprep.mubr.bf16.mxu0 %v1393_v14  ;;  %713 = vmatprep.mubr.bf16.mxu1 %v1396_v16  ;;  %v1373_v23 = vld [vmem:[%s1969_s23 + $0xa4] ss:$8 sps:$4 sm:$0xff]   ;;  %v1378_v26 = vld [vmem:[%s1969_s23 + $0xb0] ss:$8 sps:$4 sm:$0xff]   ;;  %v1381_v28 = vld [vmem:[%s1969_s23 + $0xc0] ss:$8 sps:$4 sm:$0xff]  }
  0xa7   : > { %v1379_v27 = vld [vmem:[%s1969_s23 + $0xc4] ss:$8 sps:$4 sm:$0xff]   ;;  %v1382_v29 = vld [vmem:[%s1969_s23 + $0xd4] ss:$8 sps:$4 sm:$0xff]   ;;  %v1384_v30 = vld [vmem:[%s1969_s23 + $0xd0] ss:$8 sps:$4 sm:$0xff]  }
  0xa8   : > { %646 = vmatpush1.bf16.msra.mxu0 %v1351_v6  ;;  %1175 = vmatpush1.bf16.msra.mxu1 %v1351_v6  ;;  %v1385_v31 = vld [vmem:[%s1969_s23 + $0xe4] ss:$8 sps:$4 sm:$0xff]   ;;  %v1387_v32 = vld [vmem:[%s1969_s23 + $0xe0] ss:$8 sps:$4 sm:$0xff]   ;;  %v1388_v33 = vld [vmem:[%s1969_s23 + $0xf4] ss:$8 sps:$4 sm:$0xff]  }
  0xa9   : > { %647 = vmatprep.subr.bf16.mxu0 %v1352_v7  ;;  %1160 = vmatprep.subr.bf16.mxu1 %v1352_v7  ;;  %v1390_v34 = vld [vmem:[%s1969_s23 + $0xf0] ss:$8 sps:$4 sm:$0xff]   ;;  %v1391_v35 = vld [vmem:[%s1962_s15] ss:$8 sps:$4 sm:$0xff]   ;;  %v1397_v37 = vld [vmem:[%s1962_s15 + $0x14] ss:$8 sps:$4 sm:$0xff]  }
  0xaa   : > { %v1394_v36 = vld [vmem:[%s1962_s15 + $0x40] ss:$8 sps:$4 sm:$0xff]   ;;  %v1399_v38 = vld [vmem:[%s1962_s15 + $0x54] ss:$8 sps:$4 sm:$0xff]   ;;  %v1401_v39 = vld [vmem:[%s1962_s15 + $0x10] ss:$8 sps:$4 sm:$0xff]  }
  0xab   : > { %v1402_v40 = vld [vmem:[%s1962_s15 + $0x50] ss:$8 sps:$4 sm:$0xff]   ;;  %v1403_v41 = vld [vmem:[%s1962_s15 + $0x24] ss:$8 sps:$4 sm:$0xff]   ;;  %v1407_v43 = vld [vmem:[%s1962_s15 + $0x20] ss:$8 sps:$4 sm:$0xff]  }
  0xac   : > { %648 = vmatpush1.bf16.msra.mxu0 %v1354_v8  ;;  %1176 = vmatpush1.bf16.msra.mxu1 %v1354_v8  ;;  %v1405_v42 = vld [vmem:[%s1962_s15 + $0x64] ss:$8 sps:$4 sm:$0xff]   ;;  %v1408_v44 = vld [vmem:[%s1962_s15 + $0x60] ss:$8 sps:$4 sm:$0xff]   ;;  %v1409_v45 = vld [vmem:[%s1962_s15 + $0x34] ss:$8 sps:$4 sm:$0xff]  }
  0xad   : > { %649 = vmatprep.subr.bf16.mxu0 %v1355_v9  ;;  %1161 = vmatprep.subr.bf16.mxu1 %v1355_v9  ;;  %v1411_v46 = vld [vmem:[%s1962_s15 + $0x74] ss:$8 sps:$4 sm:$0xff]   ;;  %v1413_v47 = vld [vmem:[%s1962_s15 + $0x30] ss:$8 sps:$4 sm:$0xff]   ;;  %v321_v49 = vld [vmem:[#allocation2] sm:$0xff] }
  0xae   : > { %v1414_v48 = vld [vmem:[%s1962_s15 + $0x70] ss:$8 sps:$4 sm:$0xff]   ;;  %v337_v50 = vld [vmem:[#allocation2 + $0x80] sm:$0xff]  ;;  %v322_v51 = vld [vmem:[#allocation2 + $0x8] sm:$0xff]  ;;  %s2268_s15 = sld [smem:[#allocation12_spill]] }
  0xaf   : > { %v338_v52 = vld [vmem:[#allocation2 + $0x88] sm:$0xff]  ;;  %v323_v55 = vld [vmem:[#allocation2 + $0x10] sm:$0xff]  ;;  %v324_v61 = vld [vmem:[#allocation2 + $0x18] sm:$0xff] }
  0xb0   : > { %650 = vmatpush1.bf16.msra.mxu0 %v1357_v10  ;;  %1177 = vmatpush1.bf16.msra.mxu1 %v1357_v10  ;;  %v339_v56 = vld [vmem:[#allocation2 + $0x90] sm:$0xff]  ;;  %v340_v62 = vld [vmem:[#allocation2 + $0x98] sm:$0xff]  ;;  %v325_v9 = vld [vmem:[#allocation2 + $0x20] sm:$0xff] }
  0xb1   : > { %651 = vmatprep.subr.bf16.mxu0 %v1358_v11  ;;  %1162 = vmatprep.subr.bf16.mxu1 %v1358_v11  ;;  %v341_v10 = vld [vmem:[#allocation2 + $0xa0] sm:$0xff]  ;;  %v326_v11 = vld [vmem:[#allocation2 + $0x28] sm:$0xff]  ;;  %v343_v16 = vld [vmem:[#allocation2 + $0xb0] sm:$0xff] }
  0xb4   : > { %652 = vmatpush1.bf16.msra.mxu0 %v1360_v12  ;;  %1178 = vmatpush1.bf16.msra.mxu1 %v1360_v12  ;;  %v342_v12 = vld [vmem:[#allocation2 + $0xa8] sm:$0xff]  ;;  %p1146_p13 = scmp.ne.s32.totalorder %s2268_s15, 1 }
  0xb5   : > { %653 = vmatprep.subr.bf16.mxu0 %v1361_v13  ;;  %1163 = vmatprep.subr.bf16.mxu1 %v1361_v13 }
  0xb8   : > { %654 = vmatpush1.bf16.msra.mxu0 %v1363_v15  ;;  %1179 = vmatpush1.bf16.msra.mxu1 %v1363_v15  ;;  %v327_v15 = vld [vmem:[#allocation2 + $0x30] sm:$0xff] }
  0xb9   : > { %655 = vmatprep.subr.bf16.mxu0 %v1364_v17  ;;  %1164 = vmatprep.subr.bf16.mxu1 %v1364_v17 }
  0xbc   : > { %656 = vmatpush1.bf16.msra.mxu0 %v1366_v18  ;;  %1180 = vmatpush1.bf16.msra.mxu1 %v1366_v18 }
  0xbd   : > { %657 = vmatprep.subr.bf16.mxu0 %v1367_v19  ;;  %1165 = vmatprep.subr.bf16.mxu1 %v1367_v19 }
  0xc0   : > { %658 = vmatpush1.bf16.msra.mxu0 %v1369_v20  ;;  %1181 = vmatpush1.bf16.msra.mxu1 %v1369_v20 }
  0xc1   : > { %659 = vmatprep.subr.bf16.mxu0 %v1370_v21  ;;  %1166 = vmatprep.subr.bf16.mxu1 %v1370_v21  ;;  %v328_v21 = vld [vmem:[#allocation2 + $0x38] sm:$0xff] }
  0xc4   : > { %660 = vmatpush1.bf16.msra.mxu0 %v1372_v22  ;;  %1182 = vmatpush1.bf16.msra.mxu1 %v1372_v22  ;;  %v344_v22 = vld [vmem:[#allocation2 + $0xb8] sm:$0xff] }
  0xc5   : > { %661 = vmatprep.subr.bf16.mxu0 %v1373_v23  ;;  %1167 = vmatprep.subr.bf16.mxu1 %v1373_v23 }
  0xc8   : > { %662 = vmatpush1.bf16.msra.mxu0 %v1375_v24  ;;  %1183 = vmatpush1.bf16.msra.mxu1 %v1375_v24 }
  0xc9   : > { %663 = vmatprep.subr.bf16.mxu0 %v1376_v25  ;;  %1168 = vmatprep.subr.bf16.mxu1 %v1376_v25 }
  0xcc   : > { %664 = vmatpush1.bf16.msra.mxu0 %v1378_v26  ;;  %1184 = vmatpush1.bf16.msra.mxu1 %v1378_v26 }
  0xcd   : > { %665 = vmatprep.subr.bf16.mxu0 %v1379_v27  ;;  %1169 = vmatprep.subr.bf16.mxu1 %v1379_v27 }
  0xd0   : > { %666 = vmatpush1.bf16.msra.mxu0 %v1381_v28  ;;  %1185 = vmatpush1.bf16.msra.mxu1 %v1381_v28 }
  0xd1   : > { %667 = vmatprep.subr.bf16.mxu0 %v1382_v29  ;;  %1170 = vmatprep.subr.bf16.mxu1 %v1382_v29 }
  0xd4   : > { %668 = vmatpush1.bf16.msra.mxu0 %v1384_v30  ;;  %1186 = vmatpush1.bf16.msra.mxu1 %v1384_v30 }
  0xd5   : > { %669 = vmatprep.subr.bf16.mxu0 %v1385_v31  ;;  %1171 = vmatprep.subr.bf16.mxu1 %v1385_v31 }
  0xd8   : > { %670 = vmatpush1.bf16.msra.mxu0 %v1387_v32  ;;  %1187 = vmatpush1.bf16.msra.mxu1 %v1387_v32 }
  0xd9   : > { %671 = vmatprep.subr.bf16.mxu0 %v1388_v33  ;;  %1172 = vmatprep.subr.bf16.mxu1 %v1388_v33  ;;  %v329_v33 = vld [vmem:[#allocation2 + $0x40] sm:$0xff] }
  0xdc   : > { %672 = vmatpush1.bf16.msra.mxu0 %v1390_v34  ;;  %1188 = vmatpush1.bf16.msra.mxu1 %v1390_v34  ;;  %v345_v34 = vld [vmem:[#allocation2 + $0xc0] sm:$0xff] }
  0xdf   : > { %674 = vmatmul.mubr.bf16.vlgmr.msra.gmra.mrb[0].mxu0 %v1391_v35  ;;  %714 = vmatmul.mubr.bf16.vlgmr.msra.gmra.mrb[0].mxu1 %v1394_v36  ;;  %v330_v35 = vld [vmem:[#allocation2 + $0x48] sm:$0xff] }
  0xe0   : > { %683 = vmatprep.mubr.bf16.mxu0 %v1397_v37  ;;  %723 = vmatprep.mubr.bf16.mxu1 %v1399_v38  ;;  %v346_v36 = vld [vmem:[#allocation2 + $0xc8] sm:$0xff] }
  0xe7   : > { %684 = vmatmul.mubr.bf16.gmra.mrb[4].mxu0 %v1401_v39  ;;  %724 = vmatmul.mubr.bf16.gmra.mrb[4].mxu1 %v1402_v40  ;;  %v331_v39 = vld [vmem:[#allocation2 + $0x50] sm:$0xff] }
  0xe8   : > { %693 = vmatprep.mubr.bf16.mxu0 %v1403_v41  ;;  %733 = vmatprep.mubr.bf16.mxu1 %v1405_v42  ;;  %v347_v40 = vld [vmem:[#allocation2 + $0xd0] sm:$0xff] }
  0xef   : > { %694 = vmatmul.mubr.bf16.gmra.mrb[8].mxu0 %v1407_v43  ;;  %734 = vmatmul.mubr.bf16.gmra.mrb[8].mxu1 %v1408_v44 }
  0xf0   : > { %703 = vmatprep.mubr.bf16.mxu0 %v1409_v45  ;;  %743 = vmatprep.mubr.bf16.mxu1 %v1411_v46  ;;  %v332_v45 = vld [vmem:[#allocation2 + $0x58] sm:$0xff] }
  0xf1   : > { %v348_v46 = vld [vmem:[#allocation2 + $0xd8] sm:$0xff] }
  0xf7   : > { %704 = vmatmul.mubr.bf16.gmra.mrb[12].mxu0 %v1413_v47  ;;  %744 = vmatmul.mubr.bf16.gmra.mrb[12].mxu1 %v1414_v48 }
 0x1b2   : > { %v675_v53 = vpop.f32.mrb[0].mxu0  ;;  %v715_v54 = vpop.f32.mrb[0].mxu1 }
 0x1b3   : > { %v754_v57 = vadd.f32 %v675_v53, %v321_v49  ;;  %v770_v58 = vadd.f32 %v715_v54, %v337_v50  ;;  %v677_v59 = vpop.f32.mrb[1].mxu0  ;;  %v717_v60 = vpop.f32.mrb[1].mxu1 }
 0x1b4   : > { %v755_v63 = vadd.f32 %v677_v59, %v322_v51  ;;  %v771_v0 = vadd.f32 %v717_v60, %v338_v52  ;;  %v679_v1 = vpop.f32.mrb[2].mxu0  ;;  %v719_v2 = vpop.f32.mrb[2].mxu1  ;;  %v334_v59 = vld [vmem:[#allocation2 + $0x68] sm:$0xff] }
 0x1b5   : > { %786 = vst [vmem:[#allocation2] sm:$0xff] %v754_v57  ;;  %802 = vst [vmem:[#allocation2 + $0x80] sm:$0xff] %v770_v58  ;;  %v756_v3 = vadd.f32 %v679_v1, %v323_v55  ;;  %v772_v4 = vadd.f32 %v719_v2, %v339_v56  ;;  %v681_v5 = vpop.f32.mrb[3].mxu0  ;;  %v721_v6 = vpop.f32.mrb[3].mxu1  ;;  %v333_v57 = vld [vmem:[#allocation2 + $0x60] sm:$0xff]  ;;  %v350_v60 = vld [vmem:[#allocation2 + $0xe8] sm:$0xff] }
 0x1b6   : > { %787 = vst [vmem:[#allocation2 + $0x8] sm:$0xff] %v755_v63  ;;  %803 = vst [vmem:[#allocation2 + $0x88] sm:$0xff] %v771_v0  ;;  %v757_v7 = vadd.f32 %v681_v5, %v324_v61  ;;  %v773_v8 = vadd.f32 %v721_v6, %v340_v62  ;;  %v349_v58 = vld [vmem:[#allocation2 + $0xe0] sm:$0xff]  ;;  %v335_v63 = vld [vmem:[#allocation2 + $0x70] sm:$0xff] }
 0x1b7   : > { %788 = vst [vmem:[#allocation2 + $0x10] sm:$0xff] %v756_v3  ;;  %804 = vst [vmem:[#allocation2 + $0x90] sm:$0xff] %v772_v4  ;;  %v351_v0 = vld [vmem:[#allocation2 + $0xf0] sm:$0xff]  ;;  %v336_v5 = vld [vmem:[#allocation2 + $0x78] sm:$0xff] }
 0x1b8   : > { %789 = vst [vmem:[#allocation2 + $0x18] sm:$0xff] %v757_v7  ;;  %805 = vst [vmem:[#allocation2 + $0x98] sm:$0xff] %v773_v8  ;;  %v352_v6 = vld [vmem:[#allocation2 + $0xf8] sm:$0xff] }
 0x1ba   : > { %v685_v13 = vpop.f32.mrb[4].mxu0  ;;  %v725_v14 = vpop.f32.mrb[4].mxu1 }
 0x1bb   : > { %v758_v17 = vadd.f32 %v685_v13, %v325_v9  ;;  %v774_v18 = vadd.f32 %v725_v14, %v341_v10  ;;  %v687_v19 = vpop.f32.mrb[5].mxu0  ;;  %v727_v20 = vpop.f32.mrb[5].mxu1 }
 0x1bc   : > { %v759_v23 = vadd.f32 %v687_v19, %v326_v11  ;;  %v775_v24 = vadd.f32 %v727_v20, %v342_v12  ;;  %v689_v25 = vpop.f32.mrb[6].mxu0  ;;  %v729_v26 = vpop.f32.mrb[6].mxu1  ;;  %v822_v20 = vld [vmem:[#allocation2] sm:$0xff] (!%p1146_p13) }
 0x1bd   : > { %790 = vst [vmem:[#allocation2 + $0x20] sm:$0xff] %v758_v17  ;;  %806 = vst [vmem:[#allocation2 + $0xa0] sm:$0xff] %v774_v18  ;;  %v760_v27 = vadd.f32 %v689_v25, %v327_v15  ;;  %v776_v28 = vadd.f32 %v729_v26, %v343_v16  ;;  %v691_v29 = vpop.f32.mrb[7].mxu0  ;;  %v731_v30 = vpop.f32.mrb[7].mxu1  ;;  %v856_v17 = vlaneseq (!%p1146_p13)  ;;  %v854_v18 = vld [vmem:[%s281_s9] sm:$0x3] (!%p1146_p13) }
 0x1be   : > { %791 = vst [vmem:[#allocation2 + $0x28] sm:$0xff] %v759_v23  ;;  %807 = vst [vmem:[#allocation2 + $0xa8] sm:$0xff] %v775_v24  ;;  %v761_v31 = vadd.f32 %v691_v29, %v328_v21  ;;  %v777_v32 = vadd.f32 %v731_v30, %v344_v22  ;;  %v823_v21 = vld [vmem:[#allocation2 + $0x8] sm:$0xff] (!%p1146_p13)  ;;  %v824_v22 = vld [vmem:[#allocation2 + $0x10] sm:$0xff] (!%p1146_p13) }
 0x1bf   : > { %792 = vst [vmem:[#allocation2 + $0x30] sm:$0xff] %v760_v27  ;;  %808 = vst [vmem:[#allocation2 + $0xb0] sm:$0xff] %v776_v28  ;;  %v857_v19 = vshrl.u32 (!%p1146_p13), %v856_v17, 7  ;;  %v825_v23 = vld [vmem:[#allocation2 + $0x18] sm:$0xff] (!%p1146_p13) }
 0x1c0   : > { %793 = vst [vmem:[#allocation2 + $0x38] sm:$0xff] %v761_v31  ;;  %809 = vst [vmem:[#allocation2 + $0xb8] sm:$0xff] %v777_v32 }
 0x1c1   : > { %v858_v24 = vsub.s32 (!%p1146_p13), 0, %v857_v19  ;;  %v862_v25 = vsub.s32 (!%p1146_p13), 1, %v857_v19 }
 0x1c2   : > { %v695_v37 = vpop.f32.mrb[8].mxu0  ;;  %v735_v38 = vpop.f32.mrb[8].mxu1 }
 0x1c3   : > { %v762_v41 = vadd.f32 %v695_v37, %v329_v33  ;;  %v778_v42 = vadd.f32 %v735_v38, %v345_v34  ;;  %v697_v43 = vpop.f32.mrb[9].mxu0  ;;  %v737_v44 = vpop.f32.mrb[9].mxu1  ;;  %v2046_v33 = vrot.slane (!%p1146_p13), %v854_v18, %v858_v24  ;;  %v2048_v34 = vrot.slane (!%p1146_p13), %v854_v18, %v862_v25 }
 0x1c4   : > { %v763_v47 = vadd.f32 %v697_v43, %v330_v35  ;;  %v779_v48 = vadd.f32 %v737_v44, %v346_v36  ;;  %v699_v49 = vpop.f32.mrb[10].mxu0  ;;  %v739_v50 = vpop.f32.mrb[10].mxu1  ;;  %v826_v26 = vld [vmem:[#allocation2 + $0x20] sm:$0xff] (!%p1146_p13) }
 0x1c5   : > { %794 = vst [vmem:[#allocation2 + $0x40] sm:$0xff] %v762_v41  ;;  %810 = vst [vmem:[#allocation2 + $0xc0] sm:$0xff] %v778_v42  ;;  %v764_v51 = vadd.f32 %v699_v49, %v331_v39  ;;  %v780_v52 = vadd.f32 %v739_v50, %v347_v40  ;;  %v701_v53 = vpop.f32.mrb[11].mxu0  ;;  %v741_v54 = vpop.f32.mrb[11].mxu1  ;;  %v827_v27 = vld [vmem:[#allocation2 + $0x28] sm:$0xff] (!%p1146_p13)  ;;  %v838_v40 = vld [vmem:[#allocation2 + $0x80] sm:$0xff] (!%p1146_p13)  ;;  %v866_v41 = vadd.f32 (!%p1146_p13), %v2046_v33, %v822_v20 }
 0x1c6   : > { %795 = vst [vmem:[#allocation2 + $0x48] sm:$0xff] %v763_v47  ;;  %811 = vst [vmem:[#allocation2 + $0xc8] sm:$0xff] %v779_v48  ;;  %v765_v55 = vadd.f32 %v701_v53, %v332_v45  ;;  %v781_v56 = vadd.f32 %v741_v54, %v348_v46  ;;  %v828_v28 = vld [vmem:[#allocation2 + $0x30] sm:$0xff] (!%p1146_p13)  ;;  %v867_v42 = vadd.f32 (!%p1146_p13), %v2048_v34, %v823_v21  ;;  %v839_v45 = vld [vmem:[#allocation2 + $0x88] sm:$0xff] (!%p1146_p13) }
 0x1c7   : > { %796 = vst [vmem:[#allocation2 + $0x50] sm:$0xff] %v764_v51  ;;  %812 = vst [vmem:[#allocation2 + $0xd0] sm:$0xff] %v780_v52  ;;  %v829_v29 = vld [vmem:[#allocation2 + $0x38] sm:$0xff] (!%p1146_p13)  ;;  %v868_v43 = vadd.f32 (!%p1146_p13), %v2046_v33, %v824_v22  ;;  %v869_v44 = vadd.f32 (!%p1146_p13), %v2048_v34, %v825_v23  ;;  %v840_v46 = vld [vmem:[#allocation2 + $0x90] sm:$0xff] (!%p1146_p13)  ;;  %v870_v48 = vadd.f32 (!%p1146_p13), %v2046_v33, %v826_v26 }
 0x1c8   : > { %797 = vst [vmem:[#allocation2 + $0x58] sm:$0xff] %v765_v55  ;;  %813 = vst [vmem:[#allocation2 + $0xd8] sm:$0xff] %v781_v56  ;;  %v841_v47 = vld [vmem:[#allocation2 + $0x98] sm:$0xff] (!%p1146_p13)  ;;  %v871_v49 = vadd.f32 (!%p1146_p13), %v2048_v34, %v827_v27  ;;  %v872_v50 = vadd.f32 (!%p1146_p13), %v2046_v33, %v828_v28  ;;  %v873_v51 = vadd.f32 (!%p1146_p13), %v2048_v34, %v829_v29  ;;  %v842_v52 = vld [vmem:[#allocation2 + $0xa0] sm:$0xff] (!%p1146_p13) }
 0x1c9   : > { %v843_v53 = vld [vmem:[#allocation2 + $0xa8] sm:$0xff] (!%p1146_p13)  ;;  %v844_v54 = vld [vmem:[#allocation2 + $0xb0] sm:$0xff] (!%p1146_p13)  ;;  %898 = vst [vmem:[%s1989_s11] sm:$0xff] (!%p1146_p13), %v866_v41  ;;  %899 = vst [vmem:[%s1989_s11 + $0x8] sm:$0xff] (!%p1146_p13), %v867_v42 }
 0x1ca   : > { %v705_v61 = vpop.f32.mrb[12].mxu0  ;;  %v745_v62 = vpop.f32.mrb[12].mxu1  ;;  %821 = sbr.rel (%p1146_p13) target bundleno = 477 (0x1dd), region = 48  ;;  %900 = vst [vmem:[%s1989_s11 + $0x10] sm:$0xff] (!%p1146_p13), %v868_v43  ;;  %901 = vst [vmem:[%s1989_s11 + $0x18] sm:$0xff] (!%p1146_p13), %v869_v44 }
 0x1cb   : > { %v766_v1 = vadd.f32 %v705_v61, %v333_v57  ;;  %v782_v2 = vadd.f32 %v745_v62, %v349_v58  ;;  %v707_v3 = vpop.f32.mrb[13].mxu0  ;;  %v747_v4 = vpop.f32.mrb[13].mxu1  ;;  %902 = vst [vmem:[%s1989_s11 + $0x20] sm:$0xff] (!%p1146_p13), %v870_v48  ;;  %903 = vst [vmem:[%s1989_s11 + $0x28] sm:$0xff] (!%p1146_p13), %v871_v49 }
 0x1cc   : > { %v767_v7 = vadd.f32 %v707_v3, %v334_v59  ;;  %v783_v8 = vadd.f32 %v747_v4, %v350_v60  ;;  %v709_v9 = vpop.f32.mrb[14].mxu0  ;;  %v749_v10 = vpop.f32.mrb[14].mxu1  ;;  %v830_v30 = vld [vmem:[#allocation2 + $0x40] sm:$0xff] (!%p1146_p13)  ;;  %v845_v59 = vld [vmem:[#allocation2 + $0xb8] sm:$0xff] (!%p1146_p13)  ;;  %904 = vst [vmem:[%s1989_s11 + $0x30] sm:$0xff] (!%p1146_p13), %v872_v50  ;;  %905 = vst [vmem:[%s1989_s11 + $0x38] sm:$0xff] (!%p1146_p13), %v873_v51 }
 0x1cd   : > { %798 = vst [vmem:[#allocation2 + $0x60] sm:$0xff] %v766_v1  ;;  %814 = vst [vmem:[#allocation2 + $0xe0] sm:$0xff] %v782_v2  ;;  %v768_v11 = vadd.f32 %v709_v9, %v335_v63  ;;  %v784_v12 = vadd.f32 %v749_v10, %v351_v0  ;;  %v711_v13 = vpop.f32.mrb[15].mxu0  ;;  %v751_v14 = vpop.f32.mrb[15].mxu1  ;;  %v831_v31 = vld [vmem:[#allocation2 + $0x48] sm:$0xff] (!%p1146_p13)  ;;  %v874_v55 = vadd.f32 (!%p1146_p13), %v2046_v33, %v830_v30  ;;  %v846_v60 = vld [vmem:[#allocation2 + $0xc0] sm:$0xff] (!%p1146_p13) }
 0x1ce   : > { %799 = vst [vmem:[#allocation2 + $0x68] sm:$0xff] %v767_v7  ;;  %815 = vst [vmem:[#allocation2 + $0xe8] sm:$0xff] %v783_v8  ;;  %v769_v15 = vadd.f32 %v711_v13, %v336_v5  ;;  %v785_v16 = vadd.f32 %v751_v14, %v352_v6  ;;  %v832_v32 = vld [vmem:[#allocation2 + $0x50] sm:$0xff] (!%p1146_p13)  ;;  %v875_v56 = vadd.f32 (!%p1146_p13), %v2048_v34, %v831_v31  ;;  %v847_v61 = vld [vmem:[#allocation2 + $0xc8] sm:$0xff] (!%p1146_p13) }
 0x1cf   : > { %800 = vst [vmem:[#allocation2 + $0x70] sm:$0xff] %v768_v11  ;;  %816 = vst [vmem:[#allocation2 + $0xf0] sm:$0xff] %v784_v12  ;;  %v833_v35 = vld [vmem:[#allocation2 + $0x58] sm:$0xff] (!%p1146_p13)  ;;  %v876_v57 = vadd.f32 (!%p1146_p13), %v2046_v33, %v832_v32  ;;  %v848_v2 = vld [vmem:[#allocation2 + $0xd0] sm:$0xff] (!%p1146_p13)  ;;  %v882_v5 = vadd.f32 (!%p1146_p13), %v2046_v33, %v838_v40  ;;  %v883_v6 = vadd.f32 (!%p1146_p13), %v2048_v34, %v839_v45 }
 0x1d0   : > { %801 = vst [vmem:[#allocation2 + $0x78] sm:$0xff] %v769_v15  ;;  %817 = vst [vmem:[#allocation2 + $0xf8] sm:$0xff] %v785_v16  ;;  %v877_v58 = vadd.f32 (!%p1146_p13), %v2048_v34, %v833_v35  ;;  %v849_v3 = vld [vmem:[#allocation2 + $0xd8] sm:$0xff] (!%p1146_p13)  ;;  %v884_v7 = vadd.f32 (!%p1146_p13), %v2046_v33, %v840_v46  ;;  %v885_v8 = vadd.f32 (!%p1146_p13), %v2048_v34, %v841_v47 }
 0x1d1   : > { %906 = vst [vmem:[%s1989_s11 + $0x40] sm:$0xff] %v874_v55  ;;  %907 = vst [vmem:[%s1989_s11 + $0x48] sm:$0xff] %v875_v56  ;;  %v886_v12 = vadd.f32 %v2046_v33, %v842_v52  ;;  %v887_v13 = vadd.f32 %v2048_v34, %v843_v53  ;;  %v888_v14 = vadd.f32 %v2046_v33, %v844_v54 }
 0x1d2   : > { %908 = vst [vmem:[%s1989_s11 + $0x50] sm:$0xff] %v876_v57  ;;  %909 = vst [vmem:[%s1989_s11 + $0x58] sm:$0xff] %v877_v58  ;;  %v889_v15 = vadd.f32 %v2048_v34, %v845_v59  ;;  %v890_v16 = vadd.f32 %v2046_v33, %v846_v60  ;;  %v891_v17 = vadd.f32 %v2048_v34, %v847_v61 }
 0x1d3   : > { %914 = vst [vmem:[%s1989_s11 + $0x80] sm:$0xff] %v882_v5  ;;  %915 = vst [vmem:[%s1989_s11 + $0x88] sm:$0xff] %v883_v6  ;;  %v892_v18 = vadd.f32 %v2046_v33, %v848_v2  ;;  %v893_v19 = vadd.f32 %v2048_v34, %v849_v3 }
 0x1d4   : > { %v834_v36 = vld [vmem:[#allocation2 + $0x60] sm:$0xff]  ;;  %916 = vst [vmem:[%s1989_s11 + $0x90] sm:$0xff] %v884_v7  ;;  %917 = vst [vmem:[%s1989_s11 + $0x98] sm:$0xff] %v885_v8 }
 0x1d5   : > { %v835_v37 = vld [vmem:[#allocation2 + $0x68] sm:$0xff]  ;;  %v878_v62 = vadd.f32 %v2046_v33, %v834_v36  ;;  %v850_v4 = vld [vmem:[#allocation2 + $0xe0] sm:$0xff]  ;;  %918 = vst [vmem:[%s1989_s11 + $0xa0] sm:$0xff] %v886_v12  ;;  %919 = vst [vmem:[%s1989_s11 + $0xa8] sm:$0xff] %v887_v13 }
 0x1d6   : > { %v836_v38 = vld [vmem:[#allocation2 + $0x70] sm:$0xff]  ;;  %v879_v63 = vadd.f32 %v2048_v34, %v835_v37  ;;  %v851_v9 = vld [vmem:[#allocation2 + $0xe8] sm:$0xff]  ;;  %920 = vst [vmem:[%s1989_s11 + $0xb0] sm:$0xff] %v888_v14  ;;  %921 = vst [vmem:[%s1989_s11 + $0xb8] sm:$0xff] %v889_v15  ;;  %v894_v20 = vadd.f32 %v2046_v33, %v850_v4 }
 0x1d7   : > { %v837_v39 = vld [vmem:[#allocation2 + $0x78] sm:$0xff]  ;;  %v880_v0 = vadd.f32 %v2046_v33, %v836_v38  ;;  %v852_v10 = vld [vmem:[#allocation2 + $0xf0] sm:$0xff]  ;;  %910 = vst [vmem:[%s1989_s11 + $0x60] sm:$0xff] %v878_v62  ;;  %v895_v21 = vadd.f32 %v2048_v34, %v851_v9  ;;  %922 = vst [vmem:[%s1989_s11 + $0xc0] sm:$0xff] %v890_v16 }
 0x1d8   : > { %v881_v1 = vadd.f32 %v2048_v34, %v837_v39  ;;  %v853_v11 = vld [vmem:[#allocation2 + $0xf8] sm:$0xff]  ;;  %911 = vst [vmem:[%s1989_s11 + $0x68] sm:$0xff] %v879_v63  ;;  %v896_v22 = vadd.f32 %v2046_v33, %v852_v10  ;;  %923 = vst [vmem:[%s1989_s11 + $0xc8] sm:$0xff] %v891_v17 }
 0x1d9   : > { %912 = vst [vmem:[%s1989_s11 + $0x70] sm:$0xff] %v880_v0  ;;  %v897_v23 = vadd.f32 %v2048_v34, %v853_v11  ;;  %924 = vst [vmem:[%s1989_s11 + $0xd0] sm:$0xff] %v892_v18 }
 0x1da   : > { %913 = vst [vmem:[%s1989_s11 + $0x78] sm:$0xff] %v881_v1  ;;  %925 = vst [vmem:[%s1989_s11 + $0xd8] sm:$0xff] %v893_v19 }
 0x1db   : > { %926 = vst [vmem:[%s1989_s11 + $0xe0] sm:$0xff] %v894_v20  ;;  %927 = vst [vmem:[%s1989_s11 + $0xe8] sm:$0xff] %v895_v21 }
 0x1dc   : > { %928 = vst [vmem:[%s1989_s11 + $0xf0] sm:$0xff] %v896_v22  ;;  %929 = vst [vmem:[%s1989_s11 + $0xf8] sm:$0xff] %v897_v23 }
 0x1dd PF: > { %s2270_s4 = sld [smem:[#allocation14_spill]]  ;;  %s947_s7 = sshll.u32 %s1989_s11, 4  ;;  %s2117_s7 = int_to_ptr.vmem [resolvable:$true] %s947_s7 }
 0x1de   : > { %s2271_s5 = sld [smem:[#allocation22_spill]]  ;;  %s2126_s3 = scalar_lea.sflag [#allocation5], %s271_s8 }
 0x1df   : > { %s1475_s26 = scalar_lea.vmem %s2117_s7, 4096  ;;  %p2272_p2 = scmp.ne.s32.totalorder %s2254_s2, 0 }
 0x1e0   : > { %p1476_p1 = scmp.ne.s32.totalorder %s2117_s7, %s1475_s26 }
 0x1e2   : > { %p1477_p9 = pnand %p1476_p1, %p2272_p2 }
 0x1e3   : > { %s1156_s6 = sshll.u32 %s2270_s4, 6 }
 0x1e4   : > { %s944_s30 = sadd.s32 %s1156_s6, %s1977_s29  ;;  %p1478_p0 = pneg %p1477_p9 }
 0x1e5   : > { %s1151_s22 = sshll.u32 %s944_s30, 7  ;;  %s1649_s29 = smov [#allocation8]  }
 0x1e6   : > { %s2122_s15 = scalar_lea.hbm %s2271_s5, %s1151_s22  ;;  %s1479_s11 = sshll.u32 %s1649_s29, 4  ;;  %s1480_s11 = int_to_ptr.vmem [resolvable:$false] %s1479_s11 }
 0x1e7   : > { %s1481_s23 = scalar_lea.vmem %s1480_s11, 8192  ;;  %p1482_p3 = scmp.lt.s32.totalorder %s2117_s7, %s1480_s11 }
 0x1e8   : > { %p1483_p5 = scmp.lt.s32.totalorder %s1481_s23, %s1475_s26 }
 0x1ea   : > { %p1484_p6 = por %p1483_p5, %p1482_p3 }
 0x1ec   : > { %p1485_p8 = pnand %p1484_p6, %p1478_p0 }
 0x1ee   : > { %1488 = shalt.err (!%p1485_p8)
}
 0x1ef   : > { %s1489_s8 = scalar_lea.hbm %s2122_s15, 4096  ;;  %s1493_s30 = scalar_lea.hbm %s2271_s5, 16384 }
 0x1f0   : > { %p1490_p10 = scmp.ne.s32.totalorder %s2122_s15, %s1489_s8  ;;  %p1494_p4 = scmp.lt.u32.totalorder %s2122_s15, %s2271_s5 }
 0x1f1   : > { %p1495_p12 = scmp.lt.u32.totalorder %s1493_s30, %s1489_s8  ;;  %p1497_p1 = scmp.lt.u32.totalorder %s1489_s8, %s2122_s15 }
 0x1f2   : > { %p1491_p11 = pnand %p1490_p10, %p2272_p2 }
 0x1f3   : > { %p1496_p13 = por %p1495_p12, %p1494_p4 }
 0x1f4   : > { %p1492_p7 = pneg %p1491_p11 }
 0x1f5   : > { %p1498_p9 = por %p1497_p1, %p1496_p13 }
 0x1f7   : > { %p1499_p0 = pnand %p1498_p9, %p1492_p7 }
 0x1f9   : > { %1502 = shalt.err (!%p1499_p0)
}
 0x1fa   : > { %s1650_s9 = smov 256   ;;  %s1651_s26 = smov 512  }
 0x1fb   : > { %s1652_s29 = smov 16  }
 0x1fc   : > { %1193 = dma.vmem_to_hbm [thread:$0]  (%p2272_p2), %s2117_s7, 4096, %s2122_s15, %s2126_s3, %s1650_s9, %s1651_s26, %s1652_s29  }
 0x1fd PF: > { %p1207_p3 = scmp.ge.s32.totalorder %s1641_s27, 2  ;;  %s962_s11 = sand.u32 1, %s1581_s12  }
 0x1fe   : > { %p2273_p5 = scmp.ne.s32.totalorder %s2256_s28, 0  ;;  %s963_s23 = scalar_lea.sflag [#allocation5], %s962_s11 }
 0x200   : > { %p1203_p6 = pnand %p1207_p3, %p2273_p5 }
 0x202   : > { %1576 = dma.done.wait (!%p1203_p6), %s963_s23, 4096  }
 0x203   : > { %1578 = vsyncadd (!%p1203_p6), %s963_s23, 4294963200  ;;  %s22_s27 = sadd.s32 1, %s1641_s27   ;;  %s2275_s23 = sld [smem:[#allocation15_spill]] }
 0x204   : > { %p2155_p8 = scmp.ge.s32.totalorder %s22_s27, 10   ;;  %s2276_s2 = sld [smem:[#allocation16_spill]] }
 0x205   : > { %s2277_s28 = sld [smem:[#allocation18_spill]]  ;;  %s2278_s26 = sld [smem:[#allocation19_spill]] }
 0x206   : > { %s2279_s12 = smov %s1585_s13  ;;  %s2280_s13 = smov %s1589_s14 }
 0x207   : > { %s2281_s14 = smov %s1904_s0  ;;  %s2282_s15 = smov %s1597_s16 }
 0x208   : > { %s2283_s16 = smov %s1601_s17  ;;  %s2284_s17 = smov %s1885_s18 }
 0x209   : > { %s2285_s18 = smov %s1609_s19  ;;  %s2286_s19 = smov %s1613_s20 }
 0x20a   : > { %s2287_s20 = smov %s1901_s21  ;;  %s2288_s21 = smov %s1629_s24 }
 0x20b   : > { %s2289_s22 = smov %s1633_s25  ;;  %s2290_s24 = smov %s2276_s2 }
 0x20c   : > { %s2291_s25 = smov %s2277_s28  ;;  %21 = sbr.rel (!%p2155_p8) target bundleno = 17 (0x11), region = 101 }
 0x213   :  { %968 = vsyncpa [#allocation4], 1 }
 0x214   :  { %970 = vsyncpa [#allocation4 + $0x1], 1 }
 0x215   :  { %971 = vsyncpa [#allocation7], 1 }
 0x216   :  { %973 = vsyncpa [#allocation7 + $0x1], 1 }
 0x217   :  { %974 = vsyncpa [#allocation5], 1 }
 0x218   :  { %976 = vsyncpa [#allocation5 + $0x1], 1 }

</bundles_post_ra>
